<compile_context>
chip_gen: v6e
topology: v6e:2x2x1
jax: 0.10.0
libtpu: 0.0.40
codegen_flags: <defaults>
</compile_context>

<pallas_src>
from functools import partial

import jax
import jax.numpy as jnp
from jax.experimental import pallas as pl
from jax.experimental.pallas import tpu as pltpu

BN_EPS = 1e-5
LEAKY_SLOPE = 0.01


def _vae_decoder_kernel(groups, rows_per_group,
                        x_ref,
                        w1_ref, g1_ref, be1_ref,
                        w2_ref, g2_ref, be2_ref,
                        w3_ref, b3_ref,
                        o_ref):
    """Fused forward for one block of `groups` independent BN batches.

    x_ref: (groups*rows_per_group, L) bf16; o_ref: (groups*rows_per_group, O) bf16.
    """
    x = x_ref[...]  # bf16, (M, L) with M = groups*rows_per_group

    def lin_bn_lrelu(h_bf16, w_ref, g_ref, be_ref):
        # Linear (hidden bias cancelled by the BN mean subtraction). bf16 operands -> MXU,
        # f32 accumulation; all following BN / activation math in f32 on the VPU.
        z = jnp.dot(h_bf16, w_ref[...], preferred_element_type=jnp.float32)   # (M, F) f32
        f = z.shape[-1]
        zg = z.reshape(groups, rows_per_group, f)            # leading-dim split only
        # BatchNorm1d training mode, per group: batch mean + biased variance, folded scale/shift.
        mean = jnp.mean(zg, axis=1, keepdims=True)            # (Gb, 1, F)
        mean_sq = jnp.mean(zg * zg, axis=1, keepdims=True)    # (Gb, 1, F)
        var = jnp.maximum(mean_sq - mean * mean, 0.0)         # clamp f32 cancellation
        scale = g_ref[...] * jax.lax.rsqrt(var + BN_EPS)      # rsqrt -> EUP (free slot)
        shift = be_ref[...] - mean * scale
        zn = zg * scale + shift                                # (Gb, B, F)
        act = jnp.maximum(zn, LEAKY_SLOPE * zn)                # LeakyReLU, 2 VALU ops
        return act.reshape(groups * rows_per_group, f)

    h = lin_bn_lrelu(x, w1_ref, g1_ref, be1_ref).astype(jnp.bfloat16)
    h = lin_bn_lrelu(h, w2_ref, g2_ref, be2_ref).astype(jnp.bfloat16)
    out = jnp.dot(h, w3_ref[...], preferred_element_type=jnp.float32) + b3_ref[...]
    o_ref[...] = out.astype(o_ref.dtype)


def _choose_groups_per_step(G, B, target_rows=256, max_rows=4096):
    """Pick Gb (divisor of G): smallest Gb with Gb*B >= target_rows (amortizes the ~0.35us/step
    grid overhead and fills MXU sublanes); if unreachable, collapse to a single step. Capped at
    max_rows so per-step f32 intermediates stay far under v7x's 64 MiB VMEM. When several
    choices reach the target, prefer one yielding an even step count (v7x: 2 TensorCores)."""
    divisors = [d for d in range(1, G + 1) if G % d == 0]
    fitting = [d for d in divisors if d * B <= max_rows] or [1]
    reaching = [d for d in fitting if d * B >= target_rows]
    if reaching:
        even_steps = [d for d in reaching if (G // d) % 2 == 0]
        return min(even_steps or reaching)
    return max(fitting)  # can't reach target -> take the fewest (usually 1) fat step(s)


def vae_decoder_forward(x, params, *, out_dtype=jnp.bfloat16):
    """Forward pass.

    x: (B, latent) float32 for a single BN batch (exactly the PyTorch module), or
       (G, B, latent) for G independent decode batches -- each group gets its own BatchNorm
       batch statistics. Groups are merged Gb-at-a-time into fat grid steps.
    """
    squeeze = x.ndim == 2
    if squeeze:
        x = x[None]
    G, B, L = x.shape
    if B < 2:
        raise ValueError("BatchNorm1d training-mode statistics need batch size >= 2")

    f1 = params["w1"].shape[1]
    f2 = params["w2"].shape[1]
    out_features = params["w3"].shape[1]

    gb = _choose_groups_per_step(G, B)
    steps = G // gb
    rows = gb * B

    # Merge Gb groups into the matmul M dimension in the wrapper (layout plumbing, no kernel
    # relayout) and cast the activations once to bf16 (halves the input HBM stream).
    x2 = x.reshape(steps, rows, L).astype(jnp.bfloat16)

    # bf16 weights for the MXU (halves weight DMA bytes); BN params / final bias stay f32.
    w1 = params["w1"].astype(jnp.bfloat16)
    w2 = params["w2"].astype(jnp.bfloat16)
    w3 = params["w3"].astype(jnp.bfloat16)

    # Hidden biases b1/b2 are NOT fed to the kernel: BN subtracts the batch mean right after
    # the Linear, so they cancel exactly.
    const_args = (w1, params["g1"], params["be1"],
                  w2, params["g2"], params["be2"],
                  w3, params["b3"])

    def _resident_spec(a):
        idx = lambda s: (0,) * a.ndim
        try:
            # Constant-index blocks don't need double buffering -> Buffered(1) halves their VMEM.
            return pl.BlockSpec(a.shape, idx, pipeline_mode=pl.Buffered(1))
        except TypeError:  # older signature without pipeline_mode
            return pl.BlockSpec(a.shape, idx)

    in_specs = ([pl.BlockSpec((pl.Squeezed(), rows, L), lambda s: (s, 0, 0))]
                + [_resident_spec(a) for a in const_args])
    out_specs = pl.BlockSpec((pl.Squeezed(), rows, out_features), lambda s: (s, 0, 0))

    # Advisory cost estimate (helps XLA schedule the custom call).
    flops = 2 * G * B * (L * f1 + f1 * f2 + f2 * out_features)
    transcendentals = G * (f1 + f2)  # rsqrt per feature per group
    bytes_accessed = (G * B * (L + out_features) * 2                      # bf16 in/out streams
                      + (L * f1 + f1 * f2 + f2 * out_features) * 2        # bf16 weights
                      + (2 * f1 + 2 * f2 + out_features) * 4)             # f32 BN params + b3

    out = pl.pallas_call(
        partial(_vae_decoder_kernel, gb, B),
        out_shape=jax.ShapeDtypeStruct((steps, rows, out_features), out_dtype),
        grid=(steps,),
        in_specs=in_specs,
        out_specs=out_specs,
        # "parallel": independent group-blocks can be sharded across v7x's two TensorCores
        # (measured no-op on single-TC v5e/v6e). VMEM limit set explicitly; at the default
        # max_rows=4096 the per-step footprint is ~12 MiB, comfortably under v7x's 64 MiB.
        compiler_params=pltpu.CompilerParams(
            dimension_semantics=("parallel",),
            vmem_limit_bytes=48 * 1024 * 1024),
        cost_estimate=pl.CostEstimate(flops=flops,
                                      transcendentals=transcendentals,
                                      bytes_accessed=bytes_accessed),
    )(x2, *const_args)

    out = out.reshape(G, B, out_features)
    return out[0] if squeeze else out


def init_vae_decoder_params(key, output_size, latent_size, up_channels):
    """Deterministic init mirroring the PyTorch module's layer shapes.

    Weights returned pre-transposed to (in, out); biases / BN params as (1, F).
    b1/b2 are kept (PyTorch has them) but are NOT fed to the kernel: BN cancels them."""
    x_factor = (output_size // latent_size) ** (1.0 / up_channels)
    dims = [latent_size]
    in_f = latent_size
    for _ in range(up_channels - 1):
        in_f = int(in_f * x_factor)
        dims.append(in_f)
    dims.append(output_size)  # e.g. [32, 64, 128, 256]

    params = {}
    keys = jax.random.split(key, 2 * (len(dims) - 1))
    for i in range(len(dims) - 1):
        fan_in, fan_out = dims[i], dims[i + 1]
        bound = 1.0 / (fan_in ** 0.5)  # PyTorch Linear default uniform bound
        w = jax.random.uniform(keys[2 * i], (fan_in, fan_out),
                               minval=-bound, maxval=bound, dtype=jnp.float32)
        b = jax.random.uniform(keys[2 * i + 1], (1, fan_out),
                               minval=-bound, maxval=bound, dtype=jnp.float32)
        idx = i + 1
        params[f"w{idx}"] = w
        params[f"b{idx}"] = b
        if i < len(dims) - 2:  # hidden layers have BatchNorm
            params[f"g{idx}"] = jnp.ones((1, fan_out), jnp.float32)
            params[f"be{idx}"] = jnp.zeros((1, fan_out), jnp.float32)
    return params, dims


def vae_decoder_reference(x, params):
    """Pure-JAX mirror of the kernel math (bf16 dot operands, folded BN, cancelled biases).
    Accepts (B, L) or (G, B, L); returns f32."""
    def one_group(xg):
        def lin_bn_lrelu(h, w, g, be):
            z = jnp.dot(h.astype(jnp.bfloat16), w.astype(jnp.bfloat16),
                        preferred_element_type=jnp.float32)
            mean = jnp.mean(z, axis=0, keepdims=True)
            var = jnp.maximum(jnp.mean(z * z, axis=0, keepdims=True) - mean * mean, 0.0)
            scale = g * jax.lax.rsqrt(var + BN_EPS)
            zn = z * scale + (be - mean * scale)
            return jnp.maximum(zn, LEAKY_SLOPE * zn)

        h = lin_bn_lrelu(xg, params["w1"], params["g1"], params["be1"])
        h = lin_bn_lrelu(h, params["w2"], params["g2"], params["be2"])
        return jnp.dot(h.astype(jnp.bfloat16), params["w3"].astype(jnp.bfloat16),
                       preferred_element_type=jnp.float32) + params["b3"]

    return one_group(x) if x.ndim == 2 else jax.vmap(one_group)(x)


def vae_decoder_reference_f32(x, params):
    """Full-fidelity f32 PyTorch-semantics forward (with hidden biases), loose check only."""
    def lin_bn_lrelu(h, w, b, g, be):
        z = h @ w + b
        mean = jnp.mean(z, axis=0, keepdims=True)
        var = jnp.mean((z - mean) ** 2, axis=0, keepdims=True)
        zn = (z - mean) / jnp.sqrt(var + BN_EPS) * g + be
        return jnp.where(zn >= 0, zn, LEAKY_SLOPE * zn)

    h = lin_bn_lrelu(x, params["w1"], params["b1"], params["g1"], params["be1"])
    h = lin_bn_lrelu(h, params["w2"], params["b2"], params["g2"], params["be2"])
    return h @ params["w3"] + params["b3"]


if __name__ == "__main__":
    # Shapes implied by the module: output_size=256, latent_size=32, up_channels=3
    #  -> Linear 32->64 + BN + LeakyReLU, Linear 64->128 + BN + LeakyReLU, Linear 128->256
    OUTPUT_SIZE, LATENT_SIZE, UP_CHANNELS, BATCH = 256, 32, 3, 8

    key = jax.random.PRNGKey(0)
    k_params, k_x, k_xg = jax.random.split(key, 3)
    params, dims = init_vae_decoder_params(k_params, OUTPUT_SIZE, LATENT_SIZE, UP_CHANNELS)

    # ---- Single BN batch (exactly the PyTorch module call); grid collapses to one step. ----
    embeddings = jax.random.normal(k_x, (BATCH, LATENT_SIZE), dtype=jnp.float32)
    out = jax.block_until_ready(vae_decoder_forward(embeddings, params))
    assert out.shape == (BATCH, OUTPUT_SIZE), out.shape

    ref = vae_decoder_reference(embeddings, params)
    assert jnp.allclose(out.astype(jnp.float32), ref, atol=3e-2, rtol=3e-2), \
        "mismatch vs kernel-math reference"

    ref_f32 = vae_decoder_reference_f32(embeddings, params)
    assert jnp.allclose(out.astype(jnp.float32), ref_f32, atol=1e-1, rtol=1e-1), \
        "drifted from f32 reference"

    # ---- Multiple independent BN batches, merged Gb-at-a-time into fat grid steps. ----
    G = 4
    xg = jax.random.normal(k_xg, (G, BATCH, LATENT_SIZE), dtype=jnp.float32)
    outg = jax.block_until_ready(vae_decoder_forward(xg, params))
    assert outg.shape == (G, BATCH, OUTPUT_SIZE), outg.shape
    refg = vae_decoder_reference(xg, params)
    assert jnp.allclose(outg.astype(jnp.float32), refg, atol=3e-2, rtol=3e-2), \
        "mismatch vs kernel-math reference (grouped)"

    print("KERNEL_OK")
</pallas_src>

<mosaic_0001>
module attributes {stable_mosaic.version = 11 : i64} {
  func.func @_vae_decoder_kernel(%arg0: i32, %arg1: memref<1x8x32xbf16, #tpu.memory_space<vmem>>, %arg2: memref<32x64xbf16, #tpu.memory_space<vmem>>, %arg3: memref<1x64xf32, #tpu.memory_space<vmem>>, %arg4: memref<1x64xf32, #tpu.memory_space<vmem>>, %arg5: memref<64x128xbf16, #tpu.memory_space<vmem>>, %arg6: memref<1x128xf32, #tpu.memory_space<vmem>>, %arg7: memref<1x128xf32, #tpu.memory_space<vmem>>, %arg8: memref<128x256xbf16, #tpu.memory_space<vmem>>, %arg9: memref<1x256xf32, #tpu.memory_space<vmem>>, %arg10: memref<1x8x256xbf16, #tpu.memory_space<vmem>>) attributes {dimension_semantics = [#tpu.dimension_semantics<parallel>], iteration_bounds = array<i64: 1>, scalar_prefetch = 0 : i64, scratch_operands = 0 : i64, tpu.core_type = #tpu.core_type<tc>, window_params = [{transform_indices = @transform_0, window_bounds = array<i64: 1, 8, 32>}, {pipeline_mode = #tpu.pipeline_mode<synchronous>, transform_indices = @transform_1, window_bounds = array<i64: 32, 64>}, {pipeline_mode = #tpu.pipeline_mode<synchronous>, transform_indices = @transform_2, window_bounds = array<i64: 1, 64>}, {pipeline_mode = #tpu.pipeline_mode<synchronous>, transform_indices = @transform_3, window_bounds = array<i64: 1, 64>}, {pipeline_mode = #tpu.pipeline_mode<synchronous>, transform_indices = @transform_4, window_bounds = array<i64: 64, 128>}, {pipeline_mode = #tpu.pipeline_mode<synchronous>, transform_indices = @transform_5, window_bounds = array<i64: 1, 128>}, {pipeline_mode = #tpu.pipeline_mode<synchronous>, transform_indices = @transform_6, window_bounds = array<i64: 1, 128>}, {pipeline_mode = #tpu.pipeline_mode<synchronous>, transform_indices = @transform_7, window_bounds = array<i64: 128, 256>}, {pipeline_mode = #tpu.pipeline_mode<synchronous>, transform_indices = @transform_8, window_bounds = array<i64: 1, 256>}, {transform_indices = @transform_9, window_bounds = array<i64: 1, 8, 256>}]} {
    %c0 = arith.constant 0 : index
    %c0_0 = arith.constant 0 : index
    %c0_1 = arith.constant 0 : index
    %0 = vector.load %arg1[%c0, %c0_0, %c0_1] : memref<1x8x32xbf16, #tpu.memory_space<vmem>>, vector<1x8x32xbf16>
    %1 = vector.shape_cast %0 : vector<1x8x32xbf16> to vector<8x32xbf16>
    %c0_2 = arith.constant 0 : index
    %c0_3 = arith.constant 0 : index
    %2 = vector.load %arg2[%c0_2, %c0_3] : memref<32x64xbf16, #tpu.memory_space<vmem>>, vector<32x64xbf16>
    %cst = arith.constant dense<0.000000e+00> : vector<8x64xf32>
    %3 = tpu.matmul %1, %2, %cst {dimension_numbers = #tpu.dot_dimension_numbers<[1], [0], [0], [1], [0, 0, 1, 1], [], []>} : vector<8x32xbf16>, vector<32x64xbf16>, vector<8x64xf32> -> vector<8x64xf32>
    %4 = vector.shape_cast %3 : vector<8x64xf32> to vector<1x8x64xf32>
    %cst_4 = arith.constant dense<0.000000e+00> : vector<1x64xf32>
    %5 = vector.multi_reduction <add>, %4, %cst_4 [1] : vector<1x8x64xf32> to vector<1x64xf32>
    %6 = vector.shape_cast %5 : vector<1x64xf32> to vector<1x1x64xf32>
    %cst_5 = arith.constant 8.000000e+00 : f32
    %7 = vector.broadcast %cst_5 : f32 to vector<1x1x64xf32>
    %8 = arith.divf %6, %7 : vector<1x1x64xf32>
    %9 = arith.mulf %4, %4 : vector<1x8x64xf32>
    %cst_6 = arith.constant dense<0.000000e+00> : vector<1x64xf32>
    %10 = vector.multi_reduction <add>, %9, %cst_6 [1] : vector<1x8x64xf32> to vector<1x64xf32>
    %11 = vector.shape_cast %10 : vector<1x64xf32> to vector<1x1x64xf32>
    %cst_7 = arith.constant 8.000000e+00 : f32
    %12 = vector.broadcast %cst_7 : f32 to vector<1x1x64xf32>
    %13 = arith.divf %11, %12 : vector<1x1x64xf32>
    %14 = arith.mulf %8, %8 : vector<1x1x64xf32>
    %15 = arith.subf %13, %14 : vector<1x1x64xf32>
    %cst_8 = arith.constant 0.000000e+00 : f32
    %16 = vector.broadcast %cst_8 : f32 to vector<1x1x64xf32>
    %17 = arith.maximumf %15, %16 : vector<1x1x64xf32>
    %c0_9 = arith.constant 0 : index
    %c0_10 = arith.constant 0 : index
    %18 = vector.load %arg3[%c0_9, %c0_10] : memref<1x64xf32, #tpu.memory_space<vmem>>, vector<1x64xf32>
    %cst_11 = arith.constant 9.99999974E-6 : f32
    %19 = vector.broadcast %cst_11 : f32 to vector<1x1x64xf32>
    %20 = arith.addf %17, %19 : vector<1x1x64xf32>
    %21 = math.rsqrt %20 : vector<1x1x64xf32>
    %22 = vector.shape_cast %18 : vector<1x64xf32> to vector<1x1x64xf32>
    %23 = arith.mulf %22, %21 : vector<1x1x64xf32>
    %c0_12 = arith.constant 0 : index
    %c0_13 = arith.constant 0 : index
    %24 = vector.load %arg4[%c0_12, %c0_13] : memref<1x64xf32, #tpu.memory_space<vmem>>, vector<1x64xf32>
    %25 = arith.mulf %8, %23 : vector<1x1x64xf32>
    %26 = vector.shape_cast %24 : vector<1x64xf32> to vector<1x1x64xf32>
    %27 = arith.subf %26, %25 : vector<1x1x64xf32>
    %28 = vector.broadcast %23 : vector<1x1x64xf32> to vector<1x8x64xf32>
    %29 = arith.mulf %4, %28 : vector<1x8x64xf32>
    %30 = vector.broadcast %27 : vector<1x1x64xf32> to vector<1x8x64xf32>
    %31 = arith.addf %29, %30 : vector<1x8x64xf32>
    %cst_14 = arith.constant 0.00999999977 : f32
    %32 = vector.broadcast %cst_14 : f32 to vector<1x8x64xf32>
    %33 = arith.mulf %32, %31 : vector<1x8x64xf32>
    %34 = arith.maximumf %31, %33 : vector<1x8x64xf32>
    %35 = vector.shape_cast %34 : vector<1x8x64xf32> to vector<8x64xf32>
    %36 = arith.truncf %35 : vector<8x64xf32> to vector<8x64xbf16>
    %c0_15 = arith.constant 0 : index
    %c0_16 = arith.constant 0 : index
    %37 = vector.load %arg5[%c0_15, %c0_16] : memref<64x128xbf16, #tpu.memory_space<vmem>>, vector<64x128xbf16>
    %cst_17 = arith.constant dense<0.000000e+00> : vector<8x128xf32>
    %38 = tpu.matmul %36, %37, %cst_17 {dimension_numbers = #tpu.dot_dimension_numbers<[1], [0], [0], [1], [0, 0, 1, 1], [], []>} : vector<8x64xbf16>, vector<64x128xbf16>, vector<8x128xf32> -> vector<8x128xf32>
    %39 = vector.shape_cast %38 : vector<8x128xf32> to vector<1x8x128xf32>
    %cst_18 = arith.constant dense<0.000000e+00> : vector<1x128xf32>
    %40 = vector.multi_reduction <add>, %39, %cst_18 [1] : vector<1x8x128xf32> to vector<1x128xf32>
    %41 = vector.shape_cast %40 : vector<1x128xf32> to vector<1x1x128xf32>
    %cst_19 = arith.constant 8.000000e+00 : f32
    %42 = vector.broadcast %cst_19 : f32 to vector<1x1x128xf32>
    %43 = arith.divf %41, %42 : vector<1x1x128xf32>
    %44 = arith.mulf %39, %39 : vector<1x8x128xf32>
    %cst_20 = arith.constant dense<0.000000e+00> : vector<1x128xf32>
    %45 = vector.multi_reduction <add>, %44, %cst_20 [1] : vector<1x8x128xf32> to vector<1x128xf32>
    %46 = vector.shape_cast %45 : vector<1x128xf32> to vector<1x1x128xf32>
    %cst_21 = arith.constant 8.000000e+00 : f32
    %47 = vector.broadcast %cst_21 : f32 to vector<1x1x128xf32>
    %48 = arith.divf %46, %47 : vector<1x1x128xf32>
    %49 = arith.mulf %43, %43 : vector<1x1x128xf32>
    %50 = arith.subf %48, %49 : vector<1x1x128xf32>
    %cst_22 = arith.constant 0.000000e+00 : f32
    %51 = vector.broadcast %cst_22 : f32 to vector<1x1x128xf32>
    %52 = arith.maximumf %50, %51 : vector<1x1x128xf32>
    %c0_23 = arith.constant 0 : index
    %c0_24 = arith.constant 0 : index
    %53 = vector.load %arg6[%c0_23, %c0_24] : memref<1x128xf32, #tpu.memory_space<vmem>>, vector<1x128xf32>
    %cst_25 = arith.constant 9.99999974E-6 : f32
    %54 = vector.broadcast %cst_25 : f32 to vector<1x1x128xf32>
    %55 = arith.addf %52, %54 : vector<1x1x128xf32>
    %56 = math.rsqrt %55 : vector<1x1x128xf32>
    %57 = vector.shape_cast %53 : vector<1x128xf32> to vector<1x1x128xf32>
    %58 = arith.mulf %57, %56 : vector<1x1x128xf32>
    %c0_26 = arith.constant 0 : index
    %c0_27 = arith.constant 0 : index
    %59 = vector.load %arg7[%c0_26, %c0_27] : memref<1x128xf32, #tpu.memory_space<vmem>>, vector<1x128xf32>
    %60 = arith.mulf %43, %58 : vector<1x1x128xf32>
    %61 = vector.shape_cast %59 : vector<1x128xf32> to vector<1x1x128xf32>
    %62 = arith.subf %61, %60 : vector<1x1x128xf32>
    %63 = vector.broadcast %58 : vector<1x1x128xf32> to vector<1x8x128xf32>
    %64 = arith.mulf %39, %63 : vector<1x8x128xf32>
    %65 = vector.broadcast %62 : vector<1x1x128xf32> to vector<1x8x128xf32>
    %66 = arith.addf %64, %65 : vector<1x8x128xf32>
    %cst_28 = arith.constant 0.00999999977 : f32
    %67 = vector.broadcast %cst_28 : f32 to vector<1x8x128xf32>
    %68 = arith.mulf %67, %66 : vector<1x8x128xf32>
    %69 = arith.maximumf %66, %68 : vector<1x8x128xf32>
    %70 = vector.shape_cast %69 : vector<1x8x128xf32> to vector<8x128xf32>
    %71 = arith.truncf %70 : vector<8x128xf32> to vector<8x128xbf16>
    %c0_29 = arith.constant 0 : index
    %c0_30 = arith.constant 0 : index
    %72 = vector.load %arg8[%c0_29, %c0_30] : memref<128x256xbf16, #tpu.memory_space<vmem>>, vector<128x256xbf16>
    %cst_31 = arith.constant dense<0.000000e+00> : vector<8x256xf32>
    %73 = tpu.matmul %71, %72, %cst_31 {dimension_numbers = #tpu.dot_dimension_numbers<[1], [0], [0], [1], [0, 0, 1, 1], [], []>} : vector<8x128xbf16>, vector<128x256xbf16>, vector<8x256xf32> -> vector<8x256xf32>
    %c0_32 = arith.constant 0 : index
    %c0_33 = arith.constant 0 : index
    %74 = vector.load %arg9[%c0_32, %c0_33] : memref<1x256xf32, #tpu.memory_space<vmem>>, vector<1x256xf32>
    %75 = vector.broadcast %74 : vector<1x256xf32> to vector<8x256xf32>
    %76 = arith.addf %73, %75 : vector<8x256xf32>
    %77 = arith.truncf %76 : vector<8x256xf32> to vector<8x256xbf16>
    %c0_34 = arith.constant 0 : index
    %c0_35 = arith.constant 0 : index
    %c0_36 = arith.constant 0 : index
    %78 = vector.load %arg10[%c0_34, %c0_35, %c0_36] : memref<1x8x256xbf16, #tpu.memory_space<vmem>>, vector<1x8x256xbf16>
    %79 = vector.shape_cast %78 : vector<1x8x256xbf16> to vector<8x256xbf16>
    %80 = vector.shape_cast %77 : vector<8x256xbf16> to vector<1x8x256xbf16>
    tpu.vector_store %arg10[%c0_34, %c0_35, %c0_36], %80 {strides = array<i32>} : memref<1x8x256xbf16, #tpu.memory_space<vmem>>, vector<1x8x256xbf16>,
    return
  }
  func.func @transform_0(%arg0: i32) -> (i32, i32, i32) {
    %c0_i32 = arith.constant 0 : i32
    %c0_i32_0 = arith.constant 0 : i32
    %c0_i32_1 = arith.constant 0 : i32
    return %arg0, %c0_i32, %c0_i32_0 : i32, i32, i32
  }
  func.func @transform_1(%arg0: i32) -> (i32, i32) {
    %c0_i32 = arith.constant 0 : i32
    %c0_i32_0 = arith.constant 0 : i32
    %c0_i32_1 = arith.constant 0 : i32
    return %c0_i32, %c0_i32_0 : i32, i32
  }
  func.func @transform_2(%arg0: i32) -> (i32, i32) {
    %c0_i32 = arith.constant 0 : i32
    %c0_i32_0 = arith.constant 0 : i32
    %c0_i32_1 = arith.constant 0 : i32
    return %c0_i32, %c0_i32_0 : i32, i32
  }
  func.func @transform_3(%arg0: i32) -> (i32, i32) {
    %c0_i32 = arith.constant 0 : i32
    %c0_i32_0 = arith.constant 0 : i32
    %c0_i32_1 = arith.constant 0 : i32
    return %c0_i32, %c0_i32_0 : i32, i32
  }
  func.func @transform_4(%arg0: i32) -> (i32, i32) {
    %c0_i32 = arith.constant 0 : i32
    %c0_i32_0 = arith.constant 0 : i32
    %c0_i32_1 = arith.constant 0 : i32
    return %c0_i32, %c0_i32_0 : i32, i32
  }
  func.func @transform_5(%arg0: i32) -> (i32, i32) {
    %c0_i32 = arith.constant 0 : i32
    %c0_i32_0 = arith.constant 0 : i32
    %c0_i32_1 = arith.constant 0 : i32
    return %c0_i32, %c0_i32_0 : i32, i32
  }
  func.func @transform_6(%arg0: i32) -> (i32, i32) {
    %c0_i32 = arith.constant 0 : i32
    %c0_i32_0 = arith.constant 0 : i32
    %c0_i32_1 = arith.constant 0 : i32
    return %c0_i32, %c0_i32_0 : i32, i32
  }
  func.func @transform_7(%arg0: i32) -> (i32, i32) {
    %c0_i32 = arith.constant 0 : i32
    %c0_i32_0 = arith.constant 0 : i32
    %c0_i32_1 = arith.constant 0 : i32
    return %c0_i32, %c0_i32_0 : i32, i32
  }
  func.func @transform_8(%arg0: i32) -> (i32, i32) {
    %c0_i32 = arith.constant 0 : i32
    %c0_i32_0 = arith.constant 0 : i32
    %c0_i32_1 = arith.constant 0 : i32
    return %c0_i32, %c0_i32_0 : i32, i32
  }
  func.func @transform_9(%arg0: i32) -> (i32, i32, i32) {
    %c0_i32 = arith.constant 0 : i32
    %c0_i32_0 = arith.constant 0 : i32
    %c0_i32_1 = arith.constant 0 : i32
    return %arg0, %c0_i32, %c0_i32_0 : i32, i32, i32
  }
}

</mosaic_0001>

<bundles_post_ra>
// kernel: tpu_custom_call.1
= control target key start
LH: loop header
LB: loop body
LE: loop exit
PB: predicated region body
PF: predicated region fallthrough
CT: control target
= control target key end

     0   :  { %14 = vsyncpa [#allocation3], 0  ;;  %s800_s0 = inlined_call_operand.hbm [shape: bf16[1,8,32], index: 0, kind: input, shape index: {}]   ;;  %s801_s1 = inlined_call_operand.hbm [shape: bf16[32,64], index: 1, kind: input, shape index: {}]   ;;  %s802_s2 = inlined_call_operand.vmem [shape: f32[1,64], index: 2, kind: input, shape index: {}]   ;;  %s803_s3 = inlined_call_operand.vmem [shape: f32[1,64], index: 3, kind: input, shape index: {}]   ;;  %s804_s4 = inlined_call_operand.hbm [shape: bf16[64,128], index: 4, kind: input, shape index: {}]   ;;  %s805_s5 = inlined_call_operand.vmem [shape: f32[1,128], index: 5, kind: input, shape index: {}]   ;;  %s806_s6 = inlined_call_operand.vmem [shape: f32[1,128], index: 6, kind: input, shape index: {}]   ;;  %s807_s7 = inlined_call_operand.hbm [shape: bf16[128,256], index: 7, kind: input, shape index: {}]   ;;  %s808_s8 = inlined_call_operand.vmem [shape: f32[1,256], index: 8, kind: input, shape index: {}]   ;;  %s809_s9 = inlined_call_operand.hbm [shape: bf16[1,8,256], index: 9, kind: output, shape index: {}]  }
   0x1   :  { %15 = vsyncpa [#allocation6], 0 }
   0x2   :  { %16 = vsyncpa [#allocation9], 0 }
   0x3   :  { %17 = vsyncpa [#allocation4], 0  ;;  %s694_s30 = smov [#allocation5]  }
   0x4   :  { %s33_s10 = sshll.u32 %s694_s30, 4  ;;  %s34_s10 = int_to_ptr.vmem [resolvable:$true] %s33_s10 }
   0x5   :  { %s594_s11 = scalar_lea.vmem %s34_s10, 256  ;;  %p599_p1 = scmp.lt.s32.totalorder %s34_s10, %s34_s10 }
   0x6   :  { %p595_p0 = scmp.ne.s32.totalorder %s34_s10, %s594_s11  ;;  %p600_p2 = scmp.lt.s32.totalorder %s594_s11, %s594_s11 }
   0x8   :  { %p601_p3 = por %p600_p2, %p599_p1 }
   0xa   :  { %p602_p4 = pnand %p601_p3, %p595_p0 }
   0xc   :  { %605 = shalt.err (!%p602_p4)
}
   0xd   :  { %s695_s12 = smov 64   ;;  %s696_s13 = smov 4  }
   0xe   :  { %39 = dma.hbm_to_vmem [thread:$0]  %s801_s1, 256, %s34_s10, [#allocation6], %s695_s12, %s695_s12, %s696_s13  }
   0xf   :  { %s697_s16 = smov [#allocation2]   ;;  %s698_s18 = smov [#allocation7]  }
  0x10   :  { %s24_s17 = sshll.u32 %s697_s16, 4  ;;  %s49_s19 = sshll.u32 %s698_s18, 4  ;;  %s25_s17 = int_to_ptr.vmem [resolvable:$true] %s24_s17  ;;  %s50_s19 = int_to_ptr.vmem [resolvable:$true] %s49_s19 }
  0x11   :  { %s614_s20 = scalar_lea.vmem %s25_s17, 64  ;;  %p619_p6 = scmp.lt.s32.totalorder %s25_s17, %s25_s17 }
  0x12   :  { %p615_p5 = scmp.ne.s32.totalorder %s25_s17, %s614_s20  ;;  %p620_p7 = scmp.lt.s32.totalorder %s614_s20, %s614_s20 }
  0x14   :  { %p621_p8 = por %p620_p7, %p619_p6 }
  0x16   :  { %p622_p9 = pnand %p621_p8, %p615_p5 }
  0x18   :  { %625 = shalt.err (!%p622_p9)
}
  0x19   :  { %27 = dma.hbm_to_vmem [thread:$0]  %s800_s0, 64, %s25_s17, [#allocation3]  }
  0x1a   :  { %s634_s23 = scalar_lea.vmem %s50_s19, 512  ;;  %p639_p11 = scmp.lt.s32.totalorder %s50_s19, %s50_s19 }
  0x1b   :  { %p635_p10 = scmp.ne.s32.totalorder %s50_s19, %s634_s23  ;;  %p640_p12 = scmp.lt.s32.totalorder %s634_s23, %s634_s23 }
  0x1d   :  { %p641_p13 = por %p640_p12, %p639_p11 }
  0x1f   :  { %p642_p0 = pnand %p641_p13, %p635_p10 }
  0x21   :  { %645 = shalt.err (!%p642_p0)
}
  0x22   :  { %55 = dma.hbm_to_vmem [thread:$0]  %s804_s4, 512, %s50_s19, [#allocation6], %s695_s12, %s695_s12, %s696_s13  }
  0x23   :  { %s699_s25 = smov [#allocation8]  }
  0x24   :  { %s65_s26 = sshll.u32 %s699_s25, 4  ;;  %s66_s26 = int_to_ptr.vmem [resolvable:$true] %s65_s26 }
  0x25   :  { %s654_s27 = scalar_lea.vmem %s66_s26, 2048  ;;  %p659_p2 = scmp.lt.s32.totalorder %s66_s26, %s66_s26 }
  0x26   :  { %p655_p1 = scmp.ne.s32.totalorder %s66_s26, %s654_s27  ;;  %p660_p3 = scmp.lt.s32.totalorder %s654_s27, %s654_s27 }
  0x28   :  { %p661_p4 = por %p660_p3, %p659_p2 }
  0x2a   :  { %p662_p5 = pnand %p661_p4, %p655_p1 }
  0x2c   :  { %665 = shalt.err (!%p662_p5)
}
  0x2d   :  { %s700_s0 = smov 128   ;;  %s701_s28 = smov 8  }
  0x2e   :  { %71 = dma.hbm_to_vmem [thread:$0]  %s807_s7, 2048, %s66_s26, [#allocation9], %s700_s0, %s700_s0, %s701_s28  }
  0x2f   :  { %686 = dma.done.wait [#allocation3], 64  }
  0x30   :  { %687 = vsyncadd [#allocation3], 4294967232 }
  0x31   :  { %688 = dma.done.wait [#allocation6], 768  }
  0x32   :  { %689 = vsyncadd [#allocation6], 4294966528 }
  0x33   :  { %690 = dma.done.wait [#allocation9], 2048  }
  0x34   :  { %691 = vsyncadd [#allocation9], 4294965248  ;;  %v702_v0 = vmov 0.0   ;;  %vm703_vm0 = vmmov 0   ;;  %v552_v1 = vld [vmem:[#allocation5 + $0x8] sm:$0xff]   ;;  %v553_v2 = vld [vmem:[#allocation5] sm:$0xff]   ;;  %v178_v33 = vlaneseq }
  0x35   :  { %520 = vmatprep.subr.bf16.mxu1 %v702_v0  ;;  %524 = vmatprep.mubr.msk.bf16.mxu1 %vm703_vm0, %v702_v0  ;;  %v87_v3 = vld [vmem:[#allocation2] sm:$0xf]  ;;  %vm104_vm1 = vcmask 261120   ;;  %v554_v4 = vld [vmem:[#allocation7 + $0x18] sm:$0xff]   ;;  %v555_v5 = vld [vmem:[#allocation7 + $0x10] sm:$0xff]   ;;  %vm148_vm2 = vcmask 523264  }
  0x36   :  { %521 = vmatpush3.bf16.msra.mxu1 %v552_v1  ;;  %v556_v6 = vld [vmem:[#allocation7 + $0x8] sm:$0xff]   ;;  %v557_v7 = vld [vmem:[#allocation7] sm:$0xff]   ;;  %v770_v34 = vshrl.u32 %v178_v33, 7  ;;  %v558_v49 = vld [vmem:[#allocation8 + $0x74] ss:$8 sps:$4 sm:$0xff]  }
  0x37   :  { %522 = vmatprep.subr.bf16.mxu1 %v702_v0  ;;  %v170_v35 = vld [vmem:[%s802_s2] sm:$0x1]  ;;  %v560_v50 = vld [vmem:[#allocation8 + $0x70] ss:$8 sps:$4 sm:$0xff]   ;;  %419 = vmatprep.subr.bf16.mxu0 %v558_v49  ;;  %v563_v52 = vld [vmem:[#allocation8 + $0x60] ss:$8 sps:$4 sm:$0xff]  }
  0x38   :  { %v776_v36 = vsub.s32 0, %v770_v34  ;;  %v174_v39 = vld [vmem:[%s803_s3] sm:$0x1]  ;;  %420 = vmatpush1.bf16.msra.mxu0 %v560_v50  ;;  %v564_v53 = vld [vmem:[#allocation8 + $0x54] ss:$8 sps:$4 sm:$0xff]  }
  0x39   :  { %v561_v51 = vld [vmem:[#allocation8 + $0x64] ss:$8 sps:$4 sm:$0xff]   ;;  %v566_v54 = vld [vmem:[#allocation8 + $0x50] ss:$8 sps:$4 sm:$0xff]   ;;  %v569_v56 = vld [vmem:[#allocation8 + $0x40] ss:$8 sps:$4 sm:$0xff]  }
  0x3a   :  { %523 = vmatpush3.bf16.msra.mxu1 %v553_v2  ;;  %421 = vmatprep.subr.bf16.mxu0 %v561_v51  ;;  %v567_v55 = vld [vmem:[#allocation8 + $0x44] ss:$8 sps:$4 sm:$0xff]   ;;  %v570_v57 = vld [vmem:[#allocation8 + $0x34] ss:$8 sps:$4 sm:$0xff]   ;;  %v572_v58 = vld [vmem:[#allocation8 + $0x30] ss:$8 sps:$4 sm:$0xff]  }
  0x3b   :  { %528 = vmatprep.subr.bf16.mxu1 %v702_v0  ;;  %v573_v59 = vld [vmem:[#allocation8 + $0x24] ss:$8 sps:$4 sm:$0xff]   ;;  %v575_v60 = vld [vmem:[#allocation8 + $0x20] ss:$8 sps:$4 sm:$0xff]   ;;  %v576_v61 = vld [vmem:[#allocation8 + $0x14] ss:$8 sps:$4 sm:$0xff]  }
  0x3c   :  { %422 = vmatpush1.bf16.msra.mxu0 %v563_v52  ;;  %v578_v62 = vld [vmem:[#allocation8 + $0x10] ss:$8 sps:$4 sm:$0xff]   ;;  %v579_v63 = vld [vmem:[#allocation8 + $0x4] ss:$8 sps:$4 sm:$0xff]   ;;  %v581_v1 = vld [vmem:[#allocation8] ss:$8 sps:$4 sm:$0xff]  }
  0x3d   :  { %525 = vmatmul.mubr.msk.bf16.vlgmr.msra.gmra.mxu1 %vm104_vm1, %v87_v3  ;;  %423 = vmatprep.subr.bf16.mxu0 %v564_v53 }
  0x3e   :  { %536 = vmatprep.mubr.msk.bf16.mxu1 %vm703_vm0, %v702_v0  ;;  %529 = vmatpush3.bf16.msra.mxu1 %v554_v4 }
  0x3f   :  { %530 = vmatprep.subr.bf16.mxu1 %v702_v0 }
  0x40   :  { %424 = vmatpush1.bf16.msra.mxu0 %v566_v54 }
  0x41   :  { %425 = vmatprep.subr.bf16.mxu0 %v567_v55 }
  0x42   :  { %531 = vmatpush3.bf16.msra.mxu1 %v555_v5 }
  0x43   :  { %532 = vmatprep.subr.bf16.mxu1 %v702_v0 }
  0x44   :  { %426 = vmatpush1.bf16.msra.mxu0 %v569_v56 }
  0x45   :  { %427 = vmatprep.subr.bf16.mxu0 %v570_v57 }
  0x46   :  { %533 = vmatpush3.bf16.msra.mxu1 %v556_v6 }
  0x47   :  { %534 = vmatprep.subr.bf16.mxu1 %v702_v0  ;;  %v704_v0 = vmov 0  }
  0x48   :  { %428 = vmatpush1.bf16.msra.mxu0 %v572_v58  ;;  %451 = vmatprep.mubr.bf16.mxu0 %v704_v0 }
  0x49   :  { %429 = vmatprep.subr.bf16.mxu0 %v573_v59 }
  0x4a   :  { %535 = vmatpush3.bf16.msra.mxu1 %v557_v7 }
  0x4c   :  { %430 = vmatpush1.bf16.msra.mxu0 %v575_v60 }
  0x4d   :  { %431 = vmatprep.subr.bf16.mxu0 %v576_v61 }
  0x50   :  { %432 = vmatpush1.bf16.msra.mxu0 %v578_v62 }
  0x51   :  { %433 = vmatprep.subr.bf16.mxu0 %v579_v63 }
  0x54   :  { %434 = vmatpush1.bf16.msra.mxu0 %v581_v1 }
  0xfd   :  { %v142_v8 = vpop.f32.mrf.mxu1 }
  0xfe   :  { %v149_v9 = vsel %vm148_vm2, %v142_v8, 0.0  ;;  %v158_v10 = vmul.f32 %v142_v8, %v142_v8 }
  0xff   :  { %v150_v11 = vrot.slane %v149_v9, 4  ;;  %v526_v12 = vpop.f32.mrf.mxu1 }
 0x100   :  { %v159_v13 = vsel %vm148_vm2, %v158_v10, 0.0 }
 0x101   :  { %v151_v14 = vadd.f32 %v150_v11, %v149_v9  ;;  %v160_v15 = vrot.slane %v159_v13, 4  ;;  %v145_v16 = vpop.f32.mrf.mxu1 }
 0x103   :  { %v152_v17 = vrot.slane %v151_v14, 2  ;;  %v161_v18 = vadd.f32 %v160_v15, %v159_v13  ;;  %v527_v19 = vpop.f32.mrf.mxu1 }
 0x105   :  { %v153_v20 = vadd.f32 %v152_v17, %v151_v14  ;;  %v162_v21 = vrot.slane %v161_v18, 2 }
 0x107   :  { %v154_v22 = vrot.slane %v153_v20, 1  ;;  %v163_v23 = vadd.f32 %v162_v21, %v161_v18 }
 0x109   :  { %v155_v24 = vadd.f32 %v154_v22, %v153_v20  ;;  %v164_v25 = vrot.slane %v163_v23, 1 }
 0x10b   :  { %v157_v26 = vmul.f32 0.125, %v155_v24  ;;  %v165_v27 = vadd.f32 %v164_v25, %v163_v23  ;;  %v287_v25 = vld [vmem:[%s805_s5] sm:$0x1] }
 0x10d   :  { %v166_v28 = vmul.f32 0.125, %v165_v27  ;;  %v167_v29 = vmul.f32 %v157_v26, %v157_v26 }
 0x10f   :  { %v168_v30 = vsub.f32 %v166_v28, %v167_v29  ;;  %v291_v28 = vld [vmem:[%s806_s6] sm:$0x1]  ;;  %s705_s6 = smov [#allocation10]  }
 0x110   :  { %s475_s15 = sshll.u32 %s705_s6, 4  ;;  %s476_s15 = int_to_ptr.vmem [resolvable:$true] %s475_s15 }
 0x111   :  { %v169_v31 = vmax.f32 %v168_v30, 0.0  ;;  %s666_s16 = scalar_lea.vmem %s476_s15, 128  ;;  %p671_p7 = scmp.lt.s32.totalorder %s476_s15, %s476_s15 }
 0x112   :  { %p667_p6 = scmp.ne.s32.totalorder %s476_s15, %s666_s16  ;;  %p672_p8 = scmp.lt.s32.totalorder %s666_s16, %s666_s16 }
 0x113   :  { %v171_v32 = vadd.f32 1e-05, %v169_v31 }
 0x114   :  { %p673_p9 = por %p672_p8, %p671_p7 }
 0x115   :  { %582 = vrsqrt.f32 %v171_v32 }
 0x116   :  { %p674_p10 = pnand %p673_p9, %p667_p6 }
 0x122   :  { %v583_v37 = vpop.eup %582 }
 0x123   :  { %v173_v38 = vmul.f32 %v583_v37, %v170_v35 }
 0x125   :  { %v175_v40 = vmul.f32 %v173_v38, %v157_v26  ;;  %v181_v41 = vrot.slane %v173_v38, %v776_v36 }
 0x127   :  { %v176_v42 = vsub.f32 %v174_v39, %v175_v40  ;;  %v183_v43 = vmul.f32 %v181_v41, %v142_v8  ;;  %v335_v40 = vsub.s32 1, %v770_v34  ;;  %v327_v41 = vld [vmem:[%s808_s8] sm:$0x3] }
 0x129   :  { %v188_v44 = vrot.slane %v176_v42, %v776_v36  ;;  %v332_v42 = vrot.slane %v327_v41, %v776_v36 }
 0x12b   :  { %v190_v45 = vadd.f32 %v188_v44, %v183_v43  ;;  %v336_v43 = vrot.slane %v327_v41, %v335_v40 }
 0x12d   :  { %v191_v46 = vmul.f32 0.01, %v190_v45 }
 0x12f   :  { %v192_v47 = vmax.f32 %v190_v45, %v191_v46 }
 0x131   :  { %v193_v48 = vpack.c.bf16 %v192_v47, %v192_v47 }
 0x133   :  { %537 = vmatmul.mubr.msk.bf16.vlgmr.msra.gmra.mxu1 %vm148_vm2, %v193_v48 }
 0x1f3   :  { %v263_v2 = vpop.f32.mrf.mxu1 }
 0x1f4   :  { %v269_v3 = vrot.slane %v263_v2, 4  ;;  %v276_v4 = vmul.f32 %v263_v2, %v263_v2 }
 0x1f5   :  { %v538_v5 = vpop.f32.mrf.mxu1 }
 0x1f6   :  { %v270_v6 = vadd.f32 %v269_v3, %v263_v2  ;;  %v277_v7 = vrot.slane %v276_v4, 4 }
 0x1f7   :  { %v266_v8 = vpop.f32.mrf.mxu1 }
 0x1f8   :  { %v271_v9 = vrot.slane %v270_v6, 2  ;;  %v278_v10 = vadd.f32 %v277_v7, %v276_v4 }
 0x1f9   :  { %v539_v11 = vpop.f32.mrf.mxu1 }
 0x1fa   :  { %v272_v12 = vadd.f32 %v271_v9, %v270_v6  ;;  %v279_v13 = vrot.slane %v278_v10, 2 }
 0x1fc   :  { %v273_v14 = vrot.slane %v272_v12, 1  ;;  %v280_v15 = vadd.f32 %v279_v13, %v278_v10 }
 0x1fe   :  { %v274_v16 = vadd.f32 %v273_v14, %v272_v12  ;;  %v281_v17 = vrot.slane %v280_v15, 1 }
 0x200   :  { %v275_v18 = vmul.f32 0.125, %v274_v16  ;;  %v282_v19 = vadd.f32 %v281_v17, %v280_v15 }
 0x202   :  { %v283_v20 = vmul.f32 0.125, %v282_v19  ;;  %v284_v21 = vmul.f32 %v275_v18, %v275_v18 }
 0x204   :  { %v285_v22 = vsub.f32 %v283_v20, %v284_v21 }
 0x206   :  { %v286_v23 = vmax.f32 %v285_v22, 0.0 }
 0x208   :  { %v288_v24 = vadd.f32 1e-05, %v286_v23 }
 0x20a   :  { %584 = vrsqrt.f32 %v288_v24 }
 0x217   :  { %v585_v26 = vpop.eup %584 }
 0x218   :  { %v290_v27 = vmul.f32 %v585_v26, %v287_v25 }
 0x21a   :  { %v292_v29 = vmul.f32 %v290_v27, %v275_v18  ;;  %v298_v30 = vrot.slane %v290_v27, %v776_v36 }
 0x21c   :  { %v293_v31 = vsub.f32 %v291_v28, %v292_v29  ;;  %v300_v32 = vmul.f32 %v298_v30, %v263_v2 }
 0x21e   :  { %v305_v33 = vrot.slane %v293_v31, %v776_v36 }
 0x220   :  { %v307_v35 = vadd.f32 %v305_v33, %v300_v32 }
 0x222   :  { %v308_v37 = vmul.f32 0.01, %v307_v35 }
 0x224   :  { %v309_v38 = vmax.f32 %v307_v35, %v308_v37 }
 0x226   :  { %v310_v39 = vpack.c.bf16 %v309_v38, %v309_v38 }
 0x228   :  { %452 = vmatmul.mubr.bf16.vlgmr.msra.gmra.mxu0 %v310_v39 }
 0x2e8   :  { %v453_v44 = vpop.f32.mrf.mxu0 }
 0x2e9   :  { %v454_v46 = vadd.f32 %v453_v44, %v332_v42 }
 0x2ea   :  { %v455_v45 = vpop.f32.mrf.mxu0 }
 0x2eb   :  { %v456_v47 = vadd.f32 %v455_v45, %v336_v43 }
 0x2ec   :  { %v457_v48 = vpop.f32.mrf.mxu0 }
 0x2ed   :  { %v511_v49 = vpack.c.bf16 %v456_v47, %v454_v46 }
 0x2ee   :  { %v458_v50 = vpop.f32.mrf.mxu0 }
 0x2ef   :  { %468 = vst [vmem:[#allocation10] sm:$0xff] %v511_v49 }
 0x2f0   :  { %677 = shalt.err (!%p674_p10)
}
 0x2f1   :  { %478 = dma.vmem_to_hbm [thread:$0]  %s476_s15, 128, %s809_s9, [#allocation4]  }
 0x2f2   :  { %692 = dma.done.wait [#allocation4], 128  }
 0x2f3   :  { %693 = vsyncadd [#allocation4], 4294967168 }
 0x2f4   :  { %482 = vsyncpa [#allocation3], 1 }
 0x2f5   :  { %483 = vsyncpa [#allocation6], 1 }
 0x2f6   :  { %484 = vsyncpa [#allocation9], 1 }
 0x2f7   :  { %485 = vsyncpa [#allocation4], 1 }

</bundles_post_ra>
